<compile_context>
chip_gen: v7x
topology: tpu7x:2x2x1
jax: 0.10.0
libtpu: 0.0.40
codegen_flags: <defaults>
</compile_context>

<pallas_src>
import jax
import jax.numpy as jnp
from jax.experimental import pallas as pl
from jax.experimental.pallas import tpu as pltpu

DROPOUT_P = 0.2
BN_EPS = 1e-5
WINDOWS = (2, 3, 4, 5)
NW = len(WINDOWS)          # 4 conv branches, one per lane 0..3
MAXW = max(WINDOWS)        # 5 filter taps max
LANES = 128                # pad the branch axis to a full vreg lane width


def cnn_kernel(x_ref, wsel_ref, vec_ref, mask_ref, scal_ref, out_ref):
    # x_ref    : (B, D, E)        f32 embeddings (torch channel dim already squeezed)
    # wsel_ref : (MAXW, E, LANES) wsel[j, :, widx] = filter row j of window widx (else 0)
    # vec_ref  : (2, LANES)       row 0: conv biases (lanes 0..3), row 1: Linear weights
    # mask_ref : (B, D, LANES)    dropout scale mask (0 or 1/(1-p)) per branch lane
    # scal_ref : (1,)  SMEM       Linear bias
    # out_ref  : (B, 1)
    B, D, E = x_ref.shape

    # ---- all four convolutions on the MXU, lane-parallel --------------------
    # acc[b*D + l, widx] = bias_widx + sum_j x[b, l+j, :] . W_widx[j, :]
    x2d = x_ref[...].reshape(B * D, E)                    # single read of x
    acc = jnp.zeros((B * D, LANES), jnp.float32)
    for j in range(MAXW):
        pj = jnp.dot(x2d, wsel_ref[j], preferred_element_type=jnp.float32)
        if j:                                             # align tap j: shift rows up by j
            pj = jnp.concatenate(
                [pj[j:, :], jnp.zeros((j, LANES), jnp.float32)], axis=0)
        acc = acc + pj
    acc = acc + vec_ref[0:1, :]                           # conv biases

    # Per-lane valid length: lane widx holds window w = widx + 2 whose output
    # has L_w = D - 1 - widx positions; unused lanes are all-zero and treated
    # as fully valid so no NaN/Inf can appear there.
    lane = jax.lax.broadcasted_iota(jnp.int32, (1, LANES), 1)
    lens = jnp.where(lane < NW, (D - 1) - lane, D)        # (1, LANES)
    lens_f = lens.astype(jnp.float32)
    lpos = jax.lax.broadcasted_iota(jnp.int32, (B * D, 1), 0) % D
    valid = lpos < lens                                   # (B*D, LANES)

    # ---- BatchNorm1d(1), training mode: one-pass global stats per branch ----
    accm = jnp.where(valid, acc, 0.0)
    n = lens_f * float(B)
    s = jnp.sum(accm, axis=0, keepdims=True)              # (1, LANES)
    sq = jnp.sum(accm * accm, axis=0, keepdims=True)      # (1, LANES)
    mean = s / n
    var = jnp.maximum(sq / n - mean * mean, 0.0)          # biased variance
    y = (acc - mean) * jax.lax.rsqrt(var + BN_EPS)

    # ---- Dropout(0.2, training) + ReLU + AvgPool1d(L_w) ---------------------
    y = jnp.maximum(y * mask_ref[...].reshape(B * D, LANES), 0.0)
    y = jnp.where(valid, y, 0.0)
    pooled = jnp.sum(y.reshape(B, D, LANES), axis=1) / lens_f      # (B, LANES)

    # ---- Linear(4, 1): lane-weighted reduction + bias -----------------------
    lw = vec_ref[1:2, :]                                           # (1, LANES)
    out_ref[...] = jnp.sum(pooled * lw, axis=1, keepdims=True) + scal_ref[0]


def init_params(key, doclen, embsize):
    """Deterministic parameter init mirroring the torch module's shapes."""
    params = {}
    keys = jax.random.split(key, 10)
    for i, w in enumerate(WINDOWS):
        bound = 1.0 / (w * embsize) ** 0.5
        params[f"w{w}"] = jax.random.uniform(
            keys[2 * i], (w, embsize), jnp.float32, -bound, bound)
        params[f"b{w}"] = jax.random.uniform(
            keys[2 * i + 1], (), jnp.float32, -bound, bound)
    lb = 0.5                                              # 1/sqrt(4)
    params["lin_w"] = jax.random.uniform(keys[8], (1, 4), jnp.float32, -lb, lb)
    params["lin_b"] = jax.random.uniform(keys[9], (1,), jnp.float32, -lb, lb)
    return params


def make_dropout_mask(key, B, D):
    """One aligned draw: (B, D, LANES) scaled keep-mask; lanes >= NW unused (1.0)."""
    keep = jax.random.bernoulli(key, 1.0 - DROPOUT_P, (B, D, NW))
    m = keep.astype(jnp.float32) * (1.0 / (1.0 - DROPOUT_P))
    return jnp.concatenate(
        [m, jnp.ones((B, D, LANES - NW), jnp.float32)], axis=-1)


def cnn_forward(x_nchw, params, dropout_mask):
    """x_nchw: (B, 1, doclen, embsize) NCHW. Returns (B, 1) logits."""
    x = x_nchw[:, 0, :, :].astype(jnp.float32)            # (B, D, E)
    B, D, E = x.shape

    # Pack filter tap j of every window into lane `widx` of wsel[j] so a single
    # matmul per tap computes all four convolutions lane-parallel on the MXU.
    wsel = jnp.zeros((MAXW, E, LANES), jnp.float32)
    vec = jnp.zeros((2, LANES), jnp.float32)
    for widx, w in enumerate(WINDOWS):
        wsel = wsel.at[:w, :, widx].set(params[f"w{w}"])  # (w, E)
        vec = vec.at[0, widx].set(params[f"b{w}"])
    vec = vec.at[1, :NW].set(params["lin_w"].reshape(-1))
    scal = params["lin_b"].reshape(1).astype(jnp.float32)  # (1,) -> SMEM

    vmem = pl.BlockSpec(memory_space=pltpu.MemorySpace.VMEM)
    smem = pl.BlockSpec(memory_space=pltpu.MemorySpace.SMEM)

    return pl.pallas_call(
        cnn_kernel,
        out_shape=jax.ShapeDtypeStruct((B, 1), jnp.float32),
        in_specs=[vmem, vmem, vmem, vmem, smem],
        out_specs=vmem,
    )(x, wsel, vec, dropout_mask, scal)


def cnn_reference(x_nchw, params, dropout_mask):
    """Pure-JAX reference mirroring the torch ops directly (two-pass BN)."""
    x = x_nchw[:, 0].astype(jnp.float32)                  # (B, D, E)
    B, D, E = x.shape
    feats = []
    for widx, w in enumerate(WINDOWS):
        L = D - w + 1
        W = params[f"w{w}"]
        acc = params[f"b{w}"] + sum(
            jnp.einsum("ble,e->bl", x[:, j:j + L, :], W[j],
                       precision=jax.lax.Precision.HIGHEST)
            for j in range(w))                            # (B, L) conv output
        mean = jnp.mean(acc)
        var = jnp.mean((acc - mean) ** 2)                 # biased, two-pass
        y = (acc - mean) / jnp.sqrt(var + BN_EPS)
        y = y * dropout_mask[:, :L, widx]
        y = jnp.maximum(y, 0.0)
        feats.append(jnp.mean(y, axis=1))                 # (B,)
    f = jnp.stack(feats, axis=1)                          # (B, 4)
    return f @ params["lin_w"].T + params["lin_b"]        # (B, 1)


if __name__ == "__main__":
    B, doclen, embsize = 4, 16, 32
    key = jax.random.PRNGKey(0)
    kx, kp, kd = jax.random.split(key, 3)

    x = jax.random.normal(kx, (B, 1, doclen, embsize), jnp.float32)   # NCHW
    params = init_params(kp, doclen, embsize)
    mask = make_dropout_mask(kd, B, doclen)

    out = cnn_forward(x, params, mask)
    out = jax.block_until_ready(out)
    assert out.shape == (B, 1) and out.dtype == jnp.float32

    ref = cnn_reference(x, params, mask)
    assert jnp.allclose(out, ref, atol=2e-3, rtol=2e-3), (out, ref)
    print("KERNEL_OK")
</pallas_src>

<mosaic_0001>
module attributes {stable_mosaic.version = 11 : i64} {
  func.func @cnn_kernel(%arg0: memref<4x16x32xf32, #tpu.memory_space<vmem>>, %arg1: memref<5x32x128xf32, #tpu.memory_space<vmem>>, %arg2: memref<2x128xf32, #tpu.memory_space<vmem>>, %arg3: memref<4x16x128xf32, #tpu.memory_space<vmem>>, %arg4: memref<1xf32, #tpu.memory_space<smem>>, %arg5: memref<4x1xf32, #tpu.memory_space<vmem>>) attributes {dimension_semantics = [], scalar_prefetch = 0 : i64, scratch_operands = 0 : i64, tpu.core_type = #tpu.core_type<tc>} {
    %c0 = arith.constant 0 : index
    %c0_0 = arith.constant 0 : index
    %c0_1 = arith.constant 0 : index
    %0 = vector.load %arg0[%c0, %c0_0, %c0_1] : memref<4x16x32xf32, #tpu.memory_space<vmem>>, vector<4x16x32xf32>
    %1 = vector.shape_cast %0 : vector<4x16x32xf32> to vector<64x32xf32>
    %cst = arith.constant 0.000000e+00 : f32
    %2 = vector.broadcast %cst : f32 to vector<64x128xf32>
    %c0_2 = arith.constant 0 : index
    %c0_3 = arith.constant 0 : index
    %c0_4 = arith.constant 0 : index
    %3 = vector.load %arg1[%c0_2, %c0_3, %c0_4] : memref<5x32x128xf32, #tpu.memory_space<vmem>>, vector<1x32x128xf32>
    %4 = vector.shape_cast %3 : vector<1x32x128xf32> to vector<32x128xf32>
    %cst_5 = arith.constant dense<0.000000e+00> : vector<64x128xf32>
    %5 = tpu.matmul %1, %4, %cst_5 {dimension_numbers = #tpu.dot_dimension_numbers<[1], [0], [0], [1], [0, 0, 1, 1], [], []>} : vector<64x32xf32>, vector<32x128xf32>, vector<64x128xf32> -> vector<64x128xf32>
    %6 = arith.addf %2, %5 : vector<64x128xf32>
    %c1 = arith.constant 1 : index
    %c0_6 = arith.constant 0 : index
    %c0_7 = arith.constant 0 : index
    %7 = vector.load %arg1[%c1, %c0_6, %c0_7] : memref<5x32x128xf32, #tpu.memory_space<vmem>>, vector<1x32x128xf32>
    %8 = vector.shape_cast %7 : vector<1x32x128xf32> to vector<32x128xf32>
    %cst_8 = arith.constant dense<0.000000e+00> : vector<64x128xf32>
    %9 = tpu.matmul %1, %8, %cst_8 {dimension_numbers = #tpu.dot_dimension_numbers<[1], [0], [0], [1], [0, 0, 1, 1], [], []>} : vector<64x32xf32>, vector<32x128xf32>, vector<64x128xf32> -> vector<64x128xf32>
    %10 = vector.extract_strided_slice %9 {offsets = [1, 0], sizes = [63, 128], strides = [1, 1]} : vector<64x128xf32> to vector<63x128xf32>
    %cst_9 = arith.constant 0.000000e+00 : f32
    %11 = vector.broadcast %cst_9 : f32 to vector<1x128xf32>
    %12 = tpu.concatenate %10, %11 in 0 : vector<63x128xf32>, vector<1x128xf32> -> vector<64x128xf32>
    %13 = arith.addf %6, %12 : vector<64x128xf32>
    %c2 = arith.constant 2 : index
    %c0_10 = arith.constant 0 : index
    %c0_11 = arith.constant 0 : index
    %14 = vector.load %arg1[%c2, %c0_10, %c0_11] : memref<5x32x128xf32, #tpu.memory_space<vmem>>, vector<1x32x128xf32>
    %15 = vector.shape_cast %14 : vector<1x32x128xf32> to vector<32x128xf32>
    %cst_12 = arith.constant dense<0.000000e+00> : vector<64x128xf32>
    %16 = tpu.matmul %1, %15, %cst_12 {dimension_numbers = #tpu.dot_dimension_numbers<[1], [0], [0], [1], [0, 0, 1, 1], [], []>} : vector<64x32xf32>, vector<32x128xf32>, vector<64x128xf32> -> vector<64x128xf32>
    %17 = vector.extract_strided_slice %16 {offsets = [2, 0], sizes = [62, 128], strides = [1, 1]} : vector<64x128xf32> to vector<62x128xf32>
    %cst_13 = arith.constant 0.000000e+00 : f32
    %18 = vector.broadcast %cst_13 : f32 to vector<2x128xf32>
    %19 = tpu.concatenate %17, %18 in 0 : vector<62x128xf32>, vector<2x128xf32> -> vector<64x128xf32>
    %20 = arith.addf %13, %19 : vector<64x128xf32>
    %c3 = arith.constant 3 : index
    %c0_14 = arith.constant 0 : index
    %c0_15 = arith.constant 0 : index
    %21 = vector.load %arg1[%c3, %c0_14, %c0_15] : memref<5x32x128xf32, #tpu.memory_space<vmem>>, vector<1x32x128xf32>
    %22 = vector.shape_cast %21 : vector<1x32x128xf32> to vector<32x128xf32>
    %cst_16 = arith.constant dense<0.000000e+00> : vector<64x128xf32>
    %23 = tpu.matmul %1, %22, %cst_16 {dimension_numbers = #tpu.dot_dimension_numbers<[1], [0], [0], [1], [0, 0, 1, 1], [], []>} : vector<64x32xf32>, vector<32x128xf32>, vector<64x128xf32> -> vector<64x128xf32>
    %24 = vector.extract_strided_slice %23 {offsets = [3, 0], sizes = [61, 128], strides = [1, 1]} : vector<64x128xf32> to vector<61x128xf32>
    %cst_17 = arith.constant 0.000000e+00 : f32
    %25 = vector.broadcast %cst_17 : f32 to vector<3x128xf32>
    %26 = tpu.concatenate %24, %25 in 0 : vector<61x128xf32>, vector<3x128xf32> -> vector<64x128xf32>
    %27 = arith.addf %20, %26 : vector<64x128xf32>
    %c4 = arith.constant 4 : index
    %c0_18 = arith.constant 0 : index
    %c0_19 = arith.constant 0 : index
    %28 = vector.load %arg1[%c4, %c0_18, %c0_19] : memref<5x32x128xf32, #tpu.memory_space<vmem>>, vector<1x32x128xf32>
    %29 = vector.shape_cast %28 : vector<1x32x128xf32> to vector<32x128xf32>
    %cst_20 = arith.constant dense<0.000000e+00> : vector<64x128xf32>
    %30 = tpu.matmul %1, %29, %cst_20 {dimension_numbers = #tpu.dot_dimension_numbers<[1], [0], [0], [1], [0, 0, 1, 1], [], []>} : vector<64x32xf32>, vector<32x128xf32>, vector<64x128xf32> -> vector<64x128xf32>
    %31 = vector.extract_strided_slice %30 {offsets = [4, 0], sizes = [60, 128], strides = [1, 1]} : vector<64x128xf32> to vector<60x128xf32>
    %cst_21 = arith.constant 0.000000e+00 : f32
    %32 = vector.broadcast %cst_21 : f32 to vector<4x128xf32>
    %33 = tpu.concatenate %31, %32 in 0 : vector<60x128xf32>, vector<4x128xf32> -> vector<64x128xf32>
    %34 = arith.addf %27, %33 : vector<64x128xf32>
    %c0_22 = arith.constant 0 : index
    %c0_23 = arith.constant 0 : index
    %35 = vector.load %arg2[%c0_22, %c0_23] : memref<2x128xf32, #tpu.memory_space<vmem>>, vector<1x128xf32>
    %36 = vector.broadcast %35 : vector<1x128xf32> to vector<64x128xf32>
    %37 = arith.addf %34, %36 : vector<64x128xf32>
    %38 = tpu.iota {dimensions = array<i32: 1>} : vector<1x128xi32>
    %c4_i32 = arith.constant 4 : i32
    %39 = vector.broadcast %c4_i32 : i32 to vector<1x128xi32>
    %40 = arith.cmpi slt, %38, %39 : vector<1x128xi32>
    %c15_i32 = arith.constant 15 : i32
    %41 = vector.broadcast %c15_i32 : i32 to vector<1x128xi32>
    %42 = arith.subi %41, %38 : vector<1x128xi32>
    %c16_i32 = arith.constant 16 : i32
    %43 = vector.broadcast %c16_i32 : i32 to vector<1x128xi32>
    %44 = arith.select %40, %42, %43 : vector<1x128xi1>, vector<1x128xi32>
    %45 = arith.sitofp %44 : vector<1x128xi32> to vector<1x128xf32>
    %46 = tpu.iota {dimensions = array<i32: 0>} : vector<64x1xi32>
    %c16_i32_24 = arith.constant 16 : i32
    %c0_i32 = arith.constant 0 : i32
    %47 = arith.cmpi eq, %c16_i32_24, %c0_i32 : i32
    %c1_i32 = arith.constant 1 : i32
    %48 = arith.select %47, %c1_i32, %c16_i32_24 : i32
    %49 = vector.broadcast %48 : i32 to vector<64x1xi32>
    %50 = arith.remsi %46, %49 : vector<64x1xi32>
    %c0_i32_25 = arith.constant 0 : i32
    %51 = vector.broadcast %c0_i32_25 : i32 to vector<64x1xi32>
    %52 = arith.cmpi ne, %50, %51 : vector<64x1xi32>
    %c0_i32_26 = arith.constant 0 : i32
    %53 = vector.broadcast %c0_i32_26 : i32 to vector<64x1xi32>
    %54 = arith.cmpi slt, %50, %53 : vector<64x1xi32>
    %c0_i32_27 = arith.constant 0 : i32
    %55 = arith.cmpi slt, %48, %c0_i32_27 : i32
    %56 = vector.broadcast %55 : i1 to vector<64x1xi1>
    %57 = vector.broadcast %56 : vector<64x1xi1> to vector<64x1xi1>
    %58 = arith.xori %54, %57 : vector<64x1xi1>
    %59 = arith.andi %58, %52 : vector<64x1xi1>
    %60 = vector.broadcast %48 : i32 to vector<64x1xi32>
    %61 = arith.addi %50, %60 : vector<64x1xi32>
    %62 = arith.select %59, %61, %50 : vector<64x1xi1>, vector<64x1xi32>
    %63 = vector.broadcast %62 : vector<64x1xi32> to vector<64x128xi32>
    %64 = vector.broadcast %44 : vector<1x128xi32> to vector<64x128xi32>
    %65 = arith.cmpi slt, %63, %64 : vector<64x128xi32>
    %cst_28 = arith.constant 0.000000e+00 : f32
    %66 = vector.broadcast %cst_28 : f32 to vector<64x128xf32>
    %67 = arith.select %65, %37, %66 : vector<64x128xi1>, vector<64x128xf32>
    %cst_29 = arith.constant 4.000000e+00 : f32
    %68 = vector.broadcast %cst_29 : f32 to vector<1x128xf32>
    %69 = arith.mulf %45, %68 : vector<1x128xf32>
    %cst_30 = arith.constant dense<0.000000e+00> : vector<128xf32>
    %70 = vector.multi_reduction <add>, %67, %cst_30 [0] : vector<64x128xf32> to vector<128xf32>
    %71 = vector.shape_cast %70 : vector<128xf32> to vector<1x128xf32>
    %72 = arith.mulf %67, %67 : vector<64x128xf32>
    %cst_31 = arith.constant dense<0.000000e+00> : vector<128xf32>
    %73 = vector.multi_reduction <add>, %72, %cst_31 [0] : vector<64x128xf32> to vector<128xf32>
    %74 = vector.shape_cast %73 : vector<128xf32> to vector<1x128xf32>
    %75 = arith.divf %71, %69 : vector<1x128xf32>
    %76 = arith.divf %74, %69 : vector<1x128xf32>
    %77 = arith.mulf %75, %75 : vector<1x128xf32>
    %78 = arith.subf %76, %77 : vector<1x128xf32>
    %cst_32 = arith.constant 0.000000e+00 : f32
    %79 = vector.broadcast %cst_32 : f32 to vector<1x128xf32>
    %80 = arith.maximumf %78, %79 : vector<1x128xf32>
    %81 = vector.broadcast %75 : vector<1x128xf32> to vector<64x128xf32>
    %82 = arith.subf %37, %81 : vector<64x128xf32>
    %cst_33 = arith.constant 9.99999974E-6 : f32
    %83 = vector.broadcast %cst_33 : f32 to vector<1x128xf32>
    %84 = arith.addf %80, %83 : vector<1x128xf32>
    %85 = math.rsqrt %84 : vector<1x128xf32>
    %86 = vector.broadcast %85 : vector<1x128xf32> to vector<64x128xf32>
    %87 = arith.mulf %82, %86 : vector<64x128xf32>
    %c0_34 = arith.constant 0 : index
    %c0_35 = arith.constant 0 : index
    %c0_36 = arith.constant 0 : index
    %88 = vector.load %arg3[%c0_34, %c0_35, %c0_36] : memref<4x16x128xf32, #tpu.memory_space<vmem>>, vector<4x16x128xf32>
    %89 = vector.shape_cast %88 : vector<4x16x128xf32> to vector<64x128xf32>
    %90 = arith.mulf %87, %89 : vector<64x128xf32>
    %cst_37 = arith.constant 0.000000e+00 : f32
    %91 = vector.broadcast %cst_37 : f32 to vector<64x128xf32>
    %92 = arith.maximumf %90, %91 : vector<64x128xf32>
    %cst_38 = arith.constant 0.000000e+00 : f32
    %93 = vector.broadcast %cst_38 : f32 to vector<64x128xf32>
    %94 = arith.select %65, %92, %93 : vector<64x128xi1>, vector<64x128xf32>
    %95 = vector.shape_cast %94 : vector<64x128xf32> to vector<4x16x128xf32>
    %cst_39 = arith.constant dense<0.000000e+00> : vector<4x128xf32>
    %96 = vector.multi_reduction <add>, %95, %cst_39 [1] : vector<4x16x128xf32> to vector<4x128xf32>
    %97 = vector.broadcast %45 : vector<1x128xf32> to vector<4x128xf32>
    %98 = arith.divf %96, %97 : vector<4x128xf32>
    %c1_40 = arith.constant 1 : index
    %c0_41 = arith.constant 0 : index
    %99 = vector.load %arg2[%c1_40, %c0_41] : memref<2x128xf32, #tpu.memory_space<vmem>>, vector<1x128xf32>
    %100 = vector.broadcast %99 : vector<1x128xf32> to vector<4x128xf32>
    %101 = arith.mulf %98, %100 : vector<4x128xf32>
    %cst_42 = arith.constant dense<0.000000e+00> : vector<4xf32>
    %102 = vector.multi_reduction <add>, %101, %cst_42 [1] : vector<4x128xf32> to vector<4xf32>
    %103 = vector.shape_cast %102 : vector<4xf32> to vector<4x1xf32>
    %c0_43 = arith.constant 0 : index
    %104 = memref.load %arg4[%c0_43] : memref<1xf32, #tpu.memory_space<smem>>
    %105 = vector.broadcast %104 : f32 to vector<4x1xf32>
    %106 = arith.addf %103, %105 : vector<4x1xf32>
    %c0_44 = arith.constant 0 : index
    %c0_45 = arith.constant 0 : index
    %107 = vector.load %arg5[%c0_44, %c0_45] : memref<4x1xf32, #tpu.memory_space<vmem>>, vector<4x1xf32>
    tpu.vector_store %arg5[%c0_44, %c0_45], %106 {strides = array<i32>} : memref<4x1xf32, #tpu.memory_space<vmem>>, vector<4x1xf32>,
    return
  }
}

</mosaic_0001>

<bundles_post_ra>
// kernel: tpu_custom_call.1
= control target key start
LH: loop header
LB: loop body
LE: loop exit
PB: predicated region body
PF: predicated region fallthrough
CT: control target
= control target key end

     0   :  { %11 = vsyncpa [#allocation4], 0  ;;  %s1742_s0 = inlined_call_operand.hbm [shape: f32[4,16,32], index: 0, kind: input, shape index: {}]   ;;  %s1743_s1 = inlined_call_operand.hbm [shape: f32[5,32,128], index: 1, kind: input, shape index: {}]   ;;  %s1744_s2 = inlined_call_operand.vmem [shape: f32[2,128], index: 2, kind: input, shape index: {}]   ;;  %s1745_s3 = inlined_call_operand.hbm [shape: f32[4,16,128], index: 3, kind: input, shape index: {}]   ;;  %s1746_s4 = inlined_call_operand.<no memory space> [shape: f32[1], index: 4, kind: input, shape index: {}]   ;;  %s1747_s5 = inlined_call_operand.vmem [shape: f32[4,1], index: 5, kind: output, shape index: {}]  }
   0x1   :  { %12 = vsyncpa [#allocation6], 0  ;;  %s1428_s18 = smov [#allocation5]   ;;  %s1429_s20 = smov [#allocation3]  }
   0x2   :  { %s30_s19 = sshll.u32 %s1428_s18, 4  ;;  %s18_s21 = sshll.u32 %s1429_s20, 4  ;;  %s31_s19 = int_to_ptr.vmem [resolvable:$true] %s30_s19  ;;  %s1463_s21 = int_to_ptr.vmem [resolvable:$true] %s18_s21 }
   0x3   :  { %s1358_s24 = scalar_lea.hbm %s1743_s1, 2560 }
   0x4   :  { %p1359_p0 = scmp.ne.s32.totalorder %s1743_s1, %s1358_s24  ;;  %p1362_p1 = scmp.lt.u32.totalorder %s1358_s24, %s1743_s1 }
   0x6   :  { %p1364_p2 = pnand %p1362_p1, %p1359_p0 }
   0x8   :  { %1367 = shalt.err (!%p1364_p2)
}
   0x9   :  { %s1368_s29 = scalar_lea.vmem %s31_s19, 2560  ;;  %p1373_p4 = scmp.lt.s32.totalorder %s31_s19, %s31_s19 }
   0xa   :  { %p1369_p3 = scmp.ne.s32.totalorder %s31_s19, %s1368_s29  ;;  %p1374_p5 = scmp.lt.s32.totalorder %s1368_s29, %s1368_s29 }
   0xc   :  { %p1375_p6 = por %p1374_p5, %p1373_p4 }
   0xe   :  { %p1376_p7 = pnand %p1375_p6, %p1369_p3 }
  0x10   :  { %1379 = shalt.err (!%p1376_p7)
}
  0x11   :  { %s1430_s30 = smov 128   ;;  %s1431_s6 = smov 8  }
  0x12   :  { %36 = dma.hbm_to_vmem [thread:$0]  %s1743_s1, 2560, %s31_s19, [#allocation6], %s1430_s30, %s1430_s30, %s1431_s6  }
  0x13   :  { %s1380_s11 = scalar_lea.hbm %s1742_s0, 1024 }
  0x14   :  { %p1381_p8 = scmp.ne.s32.totalorder %s1742_s0, %s1380_s11  ;;  %p1384_p9 = scmp.lt.u32.totalorder %s1380_s11, %s1742_s0 }
  0x16   :  { %p1386_p10 = pnand %p1384_p9, %p1381_p8 }
  0x18   :  { %1389 = shalt.err (!%p1386_p10)
}
  0x19   :  { %s1390_s16 = scalar_lea.vmem %s1463_s21, 1024  ;;  %p1395_p12 = scmp.lt.s32.totalorder %s1463_s21, %s1463_s21 }
  0x1a   :  { %p1391_p11 = scmp.ne.s32.totalorder %s1463_s21, %s1390_s16  ;;  %p1396_p13 = scmp.lt.s32.totalorder %s1390_s16, %s1390_s16 }
  0x1c   :  { %p1397_p0 = por %p1396_p13, %p1395_p12 }
  0x1e   :  { %p1398_p1 = pnand %p1397_p0, %p1391_p11 }
  0x20   :  { %1401 = shalt.err (!%p1398_p1)
}
  0x21   :  { %24 = dma.hbm_to_vmem [thread:$0]  %s1742_s0, 1024, %s1463_s21, [#allocation4], %s1430_s30, %s1430_s30, %s1431_s6  }
  0x22   :  { %s1432_s18 = smov [#allocation7]   ;;  %s1402_s23 = scalar_lea.hbm %s1745_s3, 1024 }
  0x23   :  { %s44_s19 = sshll.u32 %s1432_s18, 4  ;;  %p1403_p2 = scmp.ne.s32.totalorder %s1745_s3, %s1402_s23  ;;  %s45_s19 = int_to_ptr.vmem [resolvable:$true] %s44_s19 }
  0x24   :  { %p1406_p3 = scmp.lt.u32.totalorder %s1402_s23, %s1745_s3 }
  0x26   :  { %p1408_p4 = pnand %p1406_p3, %p1403_p2 }
  0x28   :  { %1411 = shalt.err (!%p1408_p4)
}
  0x29   :  { %s1412_s28 = scalar_lea.vmem %s45_s19, 1024  ;;  %p1417_p6 = scmp.lt.s32.totalorder %s45_s19, %s45_s19 }
  0x2a   :  { %p1413_p5 = scmp.ne.s32.totalorder %s45_s19, %s1412_s28  ;;  %p1418_p7 = scmp.lt.s32.totalorder %s1412_s28, %s1412_s28 }
  0x2c   :  { %p1419_p8 = por %p1418_p7, %p1417_p6 }
  0x2e   :  { %p1420_p9 = pnand %p1419_p8, %p1413_p5 }
  0x30   :  { %1423 = shalt.err (!%p1420_p9)
}
  0x31   :  { %50 = dma.hbm_to_vmem [thread:$0]  %s1745_s3, 1024, %s45_s19, [#allocation6], %s1430_s30, %s1430_s30, %s1431_s6  }
  0x32   :  { %1424 = dma.done.wait [#allocation4], 1024  }
  0x33   :  { %1425 = vsyncadd [#allocation4], 4294966272 }
  0x34   :  { %1426 = dma.done.wait [#allocation6], 3584  }
  0x35   :  { %1427 = vsyncadd [#allocation6], 4294963712  ;;  %vm79_vm0 = vcmask 261120   ;;  %v75_v0 = vld [vmem:[#allocation5 + $0x20] sm:$0xff]  ;;  %v76_v1 = vld [vmem:[#allocation5 + $0x28] sm:$0xff]  ;;  %vm217_vm1 = vcmask 1046528  }
  0x36   :  { %v77_v2 = vld [vmem:[#allocation5 + $0x30] sm:$0xff]  ;;  %v1303_v3 = vpack.c.bf16 %v76_v1, %v75_v0  ;;  %v78_v4 = vld [vmem:[#allocation5 + $0x38] sm:$0xff]  ;;  %v1515_v5 = vld [vmem:[#allocation3] sm:$0xff]  ;;  %vm465_vm2 = vcmask 1045504   ;;  %vm616_vm3 = vcmask 1044480   ;;  %vm767_vm4 = vcmask 1043456  }
  0x37   :  { %v1517_v6 = vld [vmem:[#allocation3 + $0x20] sm:$0xff]  ;;  %v1307_v7 = vpack.c.bf16 %v78_v4, %v77_v2  ;;  %1211 = vmatprep.mubr.msk.f32.mxu0 %vm79_vm0, %v1515_v5  ;;  %v71_v9 = vld [vmem:[#allocation5 + $0x8] sm:$0xff]  ;;  %v72_v14 = vld [vmem:[#allocation5 + $0x10] sm:$0xff]  ;;  %vm1078_vm10 = vcmask 1041409   ;;  %vm1081_vm11 = vcmask 1042434   ;;  %vm1084_vm12 = vcmask 1043459  }
  0x38   :  { %1217 = vmatprep.mubr.msk.f32.mxu1 %vm79_vm0, %v1517_v6  ;;  %v70_v8 = vld [vmem:[#allocation5] sm:$0xff]  ;;  %1304 = vmatprep.subr.bf16.mxu0 %v1303_v3  ;;  %v349_v11 = vld [vmem:[#allocation5 + $0x48] sm:$0xff]  ;;  %v73_v15 = vld [vmem:[#allocation5 + $0x18] sm:$0xff]  ;;  %vm1093_vm13 = vcmask 3072  }
  0x39   :  { %1343 = vmatprep.subr.bf16.mxu1 %v1303_v3  ;;  %v348_v10 = vld [vmem:[#allocation5 + $0x40] sm:$0xff]  ;;  %1306 = vmatpush3.bf16.msra.mxu0 %v1303_v3  ;;  %v1311_v12 = vpack.c.bf16 %v71_v9, %v70_v8  ;;  %v350_v16 = vld [vmem:[#allocation5 + $0x50] sm:$0xff]  ;;  %v351_v17 = vld [vmem:[#allocation5 + $0x58] sm:$0xff]  ;;  %v1315_v22 = vpack.c.bf16 %v73_v15, %v72_v14  ;;  %v813_v15 = vlaneseq }
  0x3a   :  { %1345 = vmatpush3.bf16.msra.mxu1 %v1303_v3  ;;  %1308 = vmatprep.subr.bf16.mxu0 %v1307_v7  ;;  %v1319_v13 = vpack.c.bf16 %v349_v11, %v348_v10  ;;  %v63_v18 = vld [vmem:[#allocation3 + $0x8] sm:$0xff]  ;;  %v64_v20 = vld [vmem:[#allocation3 + $0x10] sm:$0xff]  ;;  %v1323_v23 = vpack.c.bf16 %v351_v17, %v350_v16  ;;  %v499_v24 = vld [vmem:[#allocation5 + $0x60] sm:$0xff] }
  0x3b   :  { %1344 = vmatprep.subr.bf16.mxu1 %v1307_v7  ;;  %v1523_v19 = vld [vmem:[#allocation3 + $0x28] sm:$0xff]  ;;  %v1525_v21 = vld [vmem:[#allocation3 + $0x30] sm:$0xff]  ;;  %v650_v26 = vld [vmem:[#allocation5 + $0x80] sm:$0xff] }
  0x3c   :  { %v500_v25 = vld [vmem:[#allocation5 + $0x68] sm:$0xff]  ;;  %v65_v28 = vld [vmem:[#allocation3 + $0x18] sm:$0xff]  ;;  %v501_v32 = vld [vmem:[#allocation5 + $0x70] sm:$0xff] }
  0x3d   :  { %1310 = vmatpush3.bf16.msra.mxu0 %v1307_v7  ;;  %v651_v27 = vld [vmem:[#allocation5 + $0x88] sm:$0xff]  ;;  %v69_v29 = vld [vmem:[#allocation3 + $0x38] sm:$0xff]  ;;  %v1327_v30 = vpack.c.bf16 %v500_v25, %v499_v24  ;;  %v652_v34 = vld [vmem:[#allocation5 + $0x90] sm:$0xff] }
  0x3e   :  { %1346 = vmatpush3.bf16.msra.mxu1 %v1307_v7  ;;  %1320 = vmatprep.subr.bf16.mxu0 %v1319_v13  ;;  %v1335_v31 = vpack.c.bf16 %v651_v27, %v650_v26  ;;  %v502_v33 = vld [vmem:[#allocation5 + $0x78] sm:$0xff] }
  0x3f   :  { %1312 = vmatprep.subr.bf16.mxu1 %v1311_v12  ;;  %v653_v35 = vld [vmem:[#allocation5 + $0x98] sm:$0xff]  ;;  %v1331_v36 = vpack.c.bf16 %v502_v33, %v501_v32 }
  0x40   :  { %1212 = vmatmul.mubr.msk.f32.vlgmr.msra.gmra.mrb[0].mxu0 %vm79_vm0, %v63_v18  ;;  %v1339_v37 = vpack.c.bf16 %v653_v35, %v652_v34 }
  0x41   :  { %1218 = vmatmul.mubr.msk.f32.vlgmr.msra.gmra.mrb[0].mxu1 %vm79_vm0, %v1523_v19  ;;  %1322 = vmatpush3.bf16.msra.mxu0 %v1319_v13 }
  0x42   :  { %1314 = vmatpush3.bf16.msra.mxu1 %v1311_v12  ;;  %1214 = vmatprep.mubr.msk.f32.mxu0 %vm79_vm0, %v64_v20 }
  0x43   :  { %1220 = vmatprep.mubr.msk.f32.mxu1 %vm79_vm0, %v1525_v21  ;;  %1316 = vmatprep.subr.bf16.mxu1 %v1315_v22 }
  0x44   :  { %1324 = vmatprep.subr.bf16.mxu0 %v1323_v23  ;;  %1215 = vmatmul.mubr.msk.f32.gmra.mrb[2].mxu0 %vm79_vm0, %v65_v28 }
  0x45   :  { %1221 = vmatmul.mubr.msk.f32.gmra.mrb[2].mxu1 %vm79_vm0, %v69_v29  ;;  %1326 = vmatpush3.bf16.msra.mxu0 %v1323_v23 }
  0x46   :  { %1318 = vmatpush3.bf16.msra.mxu1 %v1315_v22  ;;  %1231 = vmatprep.mubr.msk.f32.mxu1 %vm79_vm0, %v1515_v5 }
  0x47   :  { %1251 = vmatprep.mubr.msk.f32.mxu0 %vm79_vm0, %v1515_v5  ;;  %1328 = vmatprep.subr.bf16.mxu1 %v1327_v30 }
  0x48   :  { %1336 = vmatprep.subr.bf16.mxu0 %v1335_v31  ;;  %1252 = vmatmul.mubr.msk.f32.vlgmr.msra.gmra.mrb[4].mxu0 %vm79_vm0, %v63_v18 }
  0x49   :  { %1232 = vmatmul.mubr.msk.f32.vlgmr.msra.gmra.mrb[4].mxu1 %vm79_vm0, %v63_v18  ;;  %1254 = vmatprep.mubr.msk.f32.mxu0 %vm79_vm0, %v64_v20 }
  0x4a   :  { %1330 = vmatpush3.bf16.msra.mxu1 %v1327_v30  ;;  %1234 = vmatprep.mubr.msk.f32.mxu1 %vm79_vm0, %v64_v20 }
  0x4b   :  { %1338 = vmatpush3.bf16.msra.mxu0 %v1335_v31  ;;  %1332 = vmatprep.subr.bf16.mxu1 %v1331_v36 }
  0x4c   :  { %1340 = vmatprep.subr.bf16.mxu0 %v1339_v37  ;;  %1255 = vmatmul.mubr.msk.f32.gmra.mrb[6].mxu0 %vm79_vm0, %v65_v28 }
  0x4d   :  { %1235 = vmatmul.mubr.msk.f32.gmra.mrb[6].mxu1 %vm79_vm0, %v65_v28  ;;  %1257 = vmatprep.mubr.msk.f32.mxu0 %vm79_vm0, %v1517_v6 }
  0x4e   :  { %1237 = vmatprep.mubr.msk.f32.mxu1 %vm79_vm0, %v1517_v6  ;;  %1334 = vmatpush3.bf16.msra.mxu1 %v1331_v36 }
  0x4f   :  { %1342 = vmatpush3.bf16.msra.mxu0 %v1339_v37 }
  0x50   :  { %1258 = vmatmul.mubr.msk.f32.gmra.mrb[8].mxu0 %vm79_vm0, %v1523_v19 }
  0x51   :  { %1238 = vmatmul.mubr.msk.f32.gmra.mrb[8].mxu1 %vm79_vm0, %v1523_v19  ;;  %1260 = vmatprep.mubr.msk.f32.mxu0 %vm79_vm0, %v1525_v21 }
  0x52   :  { %1240 = vmatprep.mubr.msk.f32.mxu1 %vm79_vm0, %v1525_v21 }
  0x54   :  { %1261 = vmatmul.mubr.msk.f32.gmra.mrb[10].mxu0 %vm79_vm0, %v69_v29 }
  0x55   :  { %1241 = vmatmul.mubr.msk.f32.gmra.mrb[10].mxu1 %vm79_vm0, %v69_v29  ;;  %1291 = vmatprep.mubr.msk.f32.mxu0 %vm79_vm0, %v1515_v5 }
  0x56   :  { %1271 = vmatprep.mubr.msk.f32.mxu1 %vm79_vm0, %v1515_v5 }
  0x58   :  { %1292 = vmatmul.mubr.msk.f32.vlgmr.msra.gmra.mrb[12].mxu0 %vm79_vm0, %v63_v18 }
  0x59   :  { %1272 = vmatmul.mubr.msk.f32.vlgmr.msra.gmra.mrb[12].mxu1 %vm79_vm0, %v63_v18  ;;  %1294 = vmatprep.mubr.msk.f32.mxu0 %vm79_vm0, %v64_v20 }
  0x5a   :  { %1274 = vmatprep.mubr.msk.f32.mxu1 %vm79_vm0, %v64_v20 }
  0x5c   :  { %1295 = vmatmul.mubr.msk.f32.gmra.mrb[14].mxu0 %vm79_vm0, %v65_v28 }
  0x5d   :  { %1275 = vmatmul.mubr.msk.f32.gmra.mrb[14].mxu1 %vm79_vm0, %v65_v28  ;;  %1297 = vmatprep.mubr.msk.f32.mxu0 %vm79_vm0, %v1517_v6  ;;  %v814_v28 = vand.u32 127, %v813_v15 }
  0x5e   :  { %1277 = vmatprep.mubr.msk.f32.mxu1 %vm79_vm0, %v1517_v6 }
  0x5f   :  { %vm815_vm5 = vcmp.lt.s32.totalorder %v814_v28, 4 }
  0x60   :  { %1298 = vmatmul.mubr.msk.f32.gmra.mrb[16].mxu0 %vm79_vm0, %v1523_v19 }
  0x61   :  { %1278 = vmatmul.mubr.msk.f32.gmra.mrb[16].mxu1 %vm79_vm0, %v1523_v19  ;;  %1300 = vmatprep.mubr.msk.f32.mxu0 %vm79_vm0, %v1525_v21 }
  0x62   :  { %1280 = vmatprep.mubr.msk.f32.mxu1 %vm79_vm0, %v1525_v21 }
  0x64   :  { %1301 = vmatmul.mubr.msk.f32.gmra.mrb[18].mxu0 %vm79_vm0, %v69_v29 }
  0x65   :  { %1281 = vmatmul.mubr.msk.f32.gmra.mrb[18].mxu1 %vm79_vm0, %v69_v29  ;;  %v1597_v29 = vshrl.u32 %v813_v15, 7 }
 0x113   :  { %v1213_v39 = vpop.f32.mrb[0].mxu0 }
 0x114   :  { %v1219_v38 = vpop.f32.mrb[0].mxu1  ;;  %v219_v42 = vrot.slane %v1213_v39, 1  ;;  %v170_v43 = vpop.f32.mrb[1].mxu0 }
 0x115   :  { %v227_v40 = vrot.slane %v1219_v38, 1  ;;  %v190_v41 = vpop.f32.mrb[1].mxu1  ;;  %v218_v45 = vrot.slane %v170_v43, 1 }
 0x116   :  { %v225_v44 = vrot.slane %v190_v41, 1 }
 0x117   :  { %v1216_v46 = vpop.f32.mrb[2].mxu0  ;;  %v220_v48 = vsel %vm217_vm1, %v218_v45, %v219_v42  ;;  %v821_v45 = vadd.s32 8, %v1597_v29 }
 0x118   :  { %v1222_v47 = vpop.f32.mrb[2].mxu1  ;;  %v228_v49 = vsel %vm217_vm1, %v225_v44, %v227_v40  ;;  %v223_v50 = vrot.slane %v1216_v46, 1  ;;  %v180_v52 = vpop.f32.mrb[3].mxu0 }
 0x119   :  { %v231_v51 = vrot.slane %v1222_v47, 1  ;;  %v200_v53 = vpop.f32.mrb[3].mxu1  ;;  %v221_v54 = vrot.slane %v180_v52, 1 }
 0x11a   :  { %v229_v55 = vrot.slane %v200_v53, 1  ;;  %v226_v56 = vsel %vm217_vm1, %v223_v50, %v225_v44  ;;  %v816_v44 = vsub.s32 15, %v814_v28 }
 0x11b   :  { %v222_v57 = vsel %vm217_vm1, %v219_v42, %v221_v54  ;;  %v1253_v59 = vpop.f32.mrb[4].mxu0  ;;  %v224_v60 = vsel %vm217_vm1, %v221_v54, %v223_v50  ;;  %v241_v32 = vsel %vm217_vm1, %v231_v51, 0.0 }
 0x11c   :  { %v1233_v58 = vpop.f32.mrb[4].mxu1  ;;  %v230_v61 = vsel %vm217_vm1, %v227_v40, %v229_v55  ;;  %v232_v62 = vsel %vm217_vm1, %v229_v55, %v231_v51  ;;  %v467_v0 = vrot.slane %v1253_v59, 2  ;;  %v418_v2 = vpop.f32.mrb[5].mxu0  ;;  %v823_v51 = vadd.s32 24, %v1597_v29 }
 0x11d   :  { %v314_v63 = vadd.f32 %v1233_v58, %v222_v57  ;;  %v308_v1 = vpop.f32.mrb[5].mxu1  ;;  %v466_v4 = vrot.slane %v418_v2, 2 }
 0x11e   :  { %v309_v3 = vadd.f32 %v308_v1, %v220_v48  ;;  %v1620_v1 = vsel %vm815_vm5, %v816_v44, 16  ;;  %v853_v2 = vand.u32 15, %v823_v51 }
 0x11f   :  { %v468_v5 = vsel %vm465_vm2, %v466_v4, %v467_v0  ;;  %v1256_v7 = vpop.f32.mrb[6].mxu0 }
 0x120   :  { %v1236_v6 = vpop.f32.mrb[6].mxu1  ;;  %v490_v8 = vadd.f32 %v468_v5, %v309_v3  ;;  %v471_v10 = vrot.slane %v1256_v7, 2  ;;  %v428_v12 = vpop.f32.mrb[7].mxu0  ;;  %vm1640_vm7 = vcmp.lt.s32.totalorder %v853_v2, %v1620_v1 }
 0x121   :  { %v324_v9 = vadd.f32 %v1236_v6, %v226_v56  ;;  %v318_v11 = vpop.f32.mrb[7].mxu1  ;;  %v469_v14 = vrot.slane %v428_v12, 2 }
 0x122   :  { %v319_v13 = vadd.f32 %v318_v11, %v224_v60  ;;  %v839_v60 = vand.u32 15, %v821_v45 }
 0x123   :  { %v470_v16 = vsel %vm465_vm2, %v467_v0, %v469_v14  ;;  %v472_v17 = vsel %vm465_vm2, %v469_v14, %v471_v10  ;;  %v1259_v19 = vpop.f32.mrb[8].mxu0  ;;  %v1633_v14 = vadd.s32 40, %v1597_v29 }
 0x124   :  { %v1239_v18 = vpop.f32.mrb[8].mxu1  ;;  %v1593_v20 = vadd.f32 %v470_v16, %v314_v63  ;;  %v1595_v21 = vadd.f32 %v472_v17, %v319_v13  ;;  %v475_v23 = vrot.slane %v1259_v19, 2  ;;  %v438_v25 = vpop.f32.mrb[9].mxu0  ;;  %vm1628_vm6 = vcmp.lt.s32.totalorder %v839_v60, %v1620_v1 }
 0x125   :  { %v334_v22 = vadd.f32 %v1239_v18, %v230_v61  ;;  %v328_v24 = vpop.f32.mrb[9].mxu1  ;;  %v473_v27 = vrot.slane %v438_v25, 2 }
 0x126   :  { %v329_v26 = vadd.f32 %v328_v24, %v228_v49 }
 0x127   :  { %v474_v30 = vsel %vm465_vm2, %v471_v10, %v473_v27  ;;  %v476_v31 = vsel %vm465_vm2, %v473_v27, %v475_v23  ;;  %v1262_v34 = vpop.f32.mrb[10].mxu0 }
 0x128   :  { %v1242_v33 = vpop.f32.mrb[10].mxu1  ;;  %v1602_v35 = vadd.f32 %v474_v30, %v324_v9  ;;  %v1604_v36 = vadd.f32 %v476_v31, %v329_v26  ;;  %v479_v38 = vrot.slane %v1262_v34, 2  ;;  %v448_v40 = vpop.f32.mrb[11].mxu0  ;;  %v1625_v9 = vld [vmem:[%s1744_s2] ss:$0 sm:$0xff] }
 0x129   :  { %v344_v37 = vadd.f32 %v1242_v33, %v241_v32  ;;  %v338_v39 = vpop.f32.mrb[11].mxu1  ;;  %v477_v42 = vrot.slane %v448_v40, 2  ;;  %v827_v33 = vadd.s32 56, %v1597_v29 }
 0x12a   :  { %v339_v41 = vadd.f32 %v338_v39, %v232_v62  ;;  %v489_v43 = vsel %vm465_vm2, %v479_v38, 0.0  ;;  %v867_v39 = vand.u32 15, %v1633_v14 }
 0x12b   :  { %v1608_v46 = vadd.f32 %v489_v43, %v344_v37  ;;  %v478_v47 = vsel %vm465_vm2, %v475_v23, %v477_v42  ;;  %v480_v48 = vsel %vm465_vm2, %v477_v42, %v479_v38  ;;  %v1293_v50 = vpop.f32.mrb[12].mxu0 }
 0x12c   :  { %v1273_v49 = vpop.f32.mrb[12].mxu1  ;;  %v1613_v52 = vadd.f32 %v478_v47, %v334_v22  ;;  %v1615_v53 = vadd.f32 %v480_v48, %v339_v41  ;;  %v769_v56 = vrot.slane %v1293_v50, 4  ;;  %v720_v57 = vpop.f32.mrb[13].mxu0  ;;  %vm1691_vm8 = vcmp.lt.s32.totalorder %v867_v39, %v1620_v1 }
 0x12d   :  { %v618_v54 = vrot.slane %v1273_v49, 3  ;;  %v569_v55 = vpop.f32.mrb[13].mxu1  ;;  %v768_v59 = vrot.slane %v720_v57, 4 }
 0x12e   :  { %v617_v58 = vrot.slane %v569_v55, 3 }
 0x12f   :  { %v770_v62 = vsel %vm767_vm4, %v768_v59, %v769_v56  ;;  %v1296_v0 = vpop.f32.mrb[14].mxu0 }
 0x130   :  { %v619_v61 = vsel %vm616_vm3, %v617_v58, %v618_v54  ;;  %v1276_v63 = vpop.f32.mrb[14].mxu1  ;;  %v773_v5 = vrot.slane %v1296_v0, 4  ;;  %v730_v7 = vpop.f32.mrb[15].mxu0 }
 0x131   :  { %v641_v3 = vadd.f32 %v619_v61, %v490_v8  ;;  %v622_v4 = vrot.slane %v1276_v63, 3  ;;  %v579_v6 = vpop.f32.mrb[15].mxu1  ;;  %v771_v11 = vrot.slane %v730_v7, 4 }
 0x132   :  { %v620_v10 = vrot.slane %v579_v6, 3 }
 0x133   :  { %v792_v12 = vadd.f32 %v770_v62, %v641_v3  ;;  %v772_v16 = vsel %vm767_vm4, %v769_v56, %v771_v11  ;;  %v774_v17 = vsel %vm767_vm4, %v771_v11, %v773_v5  ;;  %v1299_v19 = vpop.f32.mrb[16].mxu0  ;;  %v881_v11 = vand.u32 15, %v827_v33 }
 0x134   :  { %v621_v8 = vsel %vm616_vm3, %v618_v54, %v620_v10  ;;  %v623_v15 = vsel %vm616_vm3, %v620_v10, %v622_v4  ;;  %v1279_v18 = vpop.f32.mrb[16].mxu1  ;;  %v740_v28 = vpop.f32.mrb[17].mxu0  ;;  %v777_v30 = vrot.slane %v1299_v19, 4 }
 0x135   :  { %v1645_v23 = vadd.f32 %v1625_v9, %v792_v12  ;;  %v642_v24 = vadd.f32 %v621_v8, %v1593_v20  ;;  %v643_v25 = vadd.f32 %v623_v15, %v1595_v21  ;;  %v626_v26 = vrot.slane %v1279_v18, 3  ;;  %v589_v27 = vpop.f32.mrb[17].mxu1 }
 0x136   :  { %v624_v31 = vrot.slane %v589_v27, 3  ;;  %v775_v32 = vrot.slane %v740_v28, 4  ;;  %vm1704_vm9 = vcmp.lt.s32.totalorder %v881_v11, %v1620_v1 }
 0x137   :  { %v954_v34 = vmul.f32 %v1645_v23, %v1645_v23  ;;  %v793_v37 = vadd.f32 %v772_v16, %v642_v24  ;;  %v794_v38 = vadd.f32 %v774_v17, %v643_v25  ;;  %v1302_v43 = vpop.f32.mrb[18].mxu0  ;;  %v818_v25 = vcvt.s32.f32 %v1620_v1 }
 0x138   :  { %v625_v40 = vsel %vm616_vm3, %v622_v4, %v624_v31  ;;  %v627_v20 = vsel %vm616_vm3, %v624_v31, %v626_v26  ;;  %v776_v21 = vsel %vm767_vm4, %v773_v5, %v775_v32  ;;  %v778_v41 = vsel %vm767_vm4, %v775_v32, %v777_v30  ;;  %v1282_v42 = vpop.f32.mrb[18].mxu1  ;;  %v750_v49 = vpop.f32.mrb[19].mxu0 }
 0x139   :  { %v1658_v44 = vadd.f32 %v1625_v9, %v793_v37  ;;  %v1661_v29 = vadd.f32 %v1625_v9, %v794_v38  ;;  %v644_v45 = vadd.f32 %v625_v40, %v1602_v35  ;;  %v645_v47 = vadd.f32 %v627_v20, %v1604_v36  ;;  %v599_v48 = vpop.f32.mrb[19].mxu1 }
 0x13a   :  { %v630_v50 = vrot.slane %v1282_v42, 3  ;;  %v781_v51 = vrot.slane %v1302_v43, 4  ;;  %v628_v54 = vrot.slane %v599_v48, 3  ;;  %v779_v55 = vrot.slane %v750_v49, 4 }
 0x13b   :  { %v933_v56 = vsel %vm1628_vm6, %v1658_v44, 0.0  ;;  %v956_v57 = vmul.f32 %v1661_v29, %v1661_v29  ;;  %v795_v58 = vadd.f32 %v776_v21, %v644_v45  ;;  %v796_v59 = vadd.f32 %v778_v41, %v645_v47 }
 0x13c   :  { %v941_v60 = vadd.f32 %v933_v56, %v1645_v23  ;;  %v955_v35 = vmul.f32 %v933_v56, %v933_v56  ;;  %v640_v36 = vsel %vm616_vm3, %v630_v50, 0.0  ;;  %v791_v61 = vsel %vm767_vm4, %v781_v51, 0.0 }
 0x13d   :  { %v1674_v62 = vadd.f32 %v1625_v9, %v795_v58  ;;  %v1677_v63 = vadd.f32 %v1625_v9, %v796_v59  ;;  %v648_v0 = vadd.f32 %v640_v36, %v1608_v46  ;;  %v629_v2 = vsel %vm616_vm3, %v626_v26, %v628_v54 }
 0x13e   :  { %v942_v3 = vadd.f32 %v941_v60, %v1661_v29  ;;  %v962_v4 = vadd.f32 %v955_v35, %v954_v34  ;;  %v631_v5 = vsel %vm616_vm3, %v628_v54, %v630_v50  ;;  %v646_v6 = vadd.f32 %v629_v2, %v1613_v52 }
 0x13f   :  { %v935_v7 = vsel %vm1640_vm7, %v1674_v62, 0.0  ;;  %v799_v10 = vadd.f32 %v791_v61, %v648_v0  ;;  %v647_v12 = vadd.f32 %v631_v5, %v1615_v53  ;;  %v780_v15 = vsel %vm767_vm4, %v777_v30, %v779_v55 }
 0x140   :  { %v963_v14 = vadd.f32 %v962_v4, %v956_v57  ;;  %v943_v8 = vadd.f32 %v942_v3, %v935_v7  ;;  %v957_v46 = vmul.f32 %v935_v7, %v935_v7  ;;  %v782_v16 = vsel %vm767_vm4, %v779_v55, %v781_v51 }
 0x141   :  { %v797_v17 = vadd.f32 %v780_v15, %v646_v6  ;;  %v958_v52 = vmul.f32 %v1677_v63, %v1677_v63  ;;  %v798_v24 = vadd.f32 %v782_v16, %v647_v12  ;;  %v1700_v26 = vadd.f32 %v1625_v9, %v799_v10  ;;  %v999_v15 = vld [vmem:[#allocation7] sm:$0xff]  ;;  %v1000_v16 = vld [vmem:[#allocation7 + $0x8] sm:$0xff] }
 0x142   :  { %v964_v19 = vadd.f32 %v963_v14, %v957_v46  ;;  %v944_v53 = vadd.f32 %v943_v8, %v1677_v63  ;;  %v940_v37 = vmul.f32 4.0, %v818_v25  ;;  %v1003_v14 = vld [vmem:[#allocation7 + $0x20] sm:$0xff]  ;;  %v1004_v8 = vld [vmem:[#allocation7 + $0x28] sm:$0xff] }
 0x143   :  { %v810_v27 = vadd.f32 %v1625_v9, %v797_v17  ;;  %v811_v30 = vadd.f32 %v1625_v9, %v798_v24  ;;  %v939_v38 = vsel %vm1704_vm9, %v1700_v26, 0.0  ;;  %v1006_v24 = vld [vmem:[#allocation7 + $0x38] sm:$0xff] }
 0x144   :  { %v965_v31 = vadd.f32 %v964_v19, %v958_v52  ;;  %v961_v21 = vmul.f32 %v939_v38, %v939_v38  ;;  %1352 = vrcp.f32 %v940_v37  ;;  %v1001_v19 = vld [vmem:[#allocation7 + $0x10] sm:$0xff] }
 0x145   :  { %v937_v32 = vsel %vm1691_vm8, %v810_v27, 0.0  ;;  %v960_v40 = vmul.f32 %v811_v30, %v811_v30 }
 0x146   :  { %v945_v33 = vadd.f32 %v944_v53, %v937_v32  ;;  %v959_v34 = vmul.f32 %v937_v32, %v937_v32 }
 0x148   :  { %v946_v39 = vadd.f32 %v945_v33, %v811_v30  ;;  %v966_v20 = vadd.f32 %v965_v31, %v959_v34 }
 0x14a   :  { %v947_v41 = vadd.f32 %v946_v39, %v939_v38  ;;  %v967_v42 = vadd.f32 %v966_v20, %v960_v40 }
 0x14c   :  { %v948_v9 = vrot.slane %v947_v41, 4  ;;  %v968_v43 = vadd.f32 %v967_v42, %v961_v21 }
 0x14e   :  { %v949_v45 = vadd.f32 %v948_v9, %v947_v41  ;;  %v969_v47 = vrot.slane %v968_v43, 4  ;;  %v1353_v56 = vpop.eup %1352 }
 0x150   :  { %v950_v48 = vrot.slane %v949_v45, 2  ;;  %v970_v49 = vadd.f32 %v969_v47, %v968_v43 }
 0x152   :  { %v951_v50 = vadd.f32 %v950_v48, %v949_v45  ;;  %v971_v51 = vrot.slane %v970_v49, 2 }
 0x154   :  { %v952_v54 = vrot.slane %v951_v50, 1  ;;  %v972_v55 = vadd.f32 %v971_v51, %v970_v49 }
 0x156   :  { %v953_v57 = vadd.f32 %v952_v54, %v951_v50  ;;  %v973_v58 = vrot.slane %v972_v55, 1 }
 0x158   :  { %v974_v59 = vadd.f32 %v973_v58, %v972_v55  ;;  %v976_v60 = vmul.f32 %v1353_v56, %v953_v57 }
 0x15a   :  { %v977_v35 = vmul.f32 %v1353_v56, %v974_v59  ;;  %v978_v36 = vmul.f32 %v976_v60, %v976_v60  ;;  %v985_v61 = vsub.f32 %v1677_v63, %v976_v60  ;;  %v986_v0 = vsub.f32 %v810_v27, %v976_v60  ;;  %v1005_v63 = vld [vmem:[#allocation7 + $0x30] sm:$0xff] }
 0x15b   :  { %v987_v2 = vsub.f32 %v811_v30, %v976_v60  ;;  %v981_v3 = vsub.f32 %v1645_v23, %v976_v60  ;;  %v982_v4 = vsub.f32 %v1658_v44, %v976_v60  ;;  %v983_v5 = vsub.f32 %v1661_v29, %v976_v60  ;;  %v1002_v29 = vld [vmem:[#allocation7 + $0x18] sm:$0xff] }
 0x15c   :  { %v979_v6 = vsub.f32 %v977_v35, %v978_v36  ;;  %v984_v7 = vsub.f32 %v1674_v62, %v976_v60  ;;  %v988_v10 = vsub.f32 %v1700_v26, %v976_v60 }
 0x15e   :  { %v980_v11 = vmax.f32 %v979_v6, 0.0 }
 0x160   :  { %v989_v12 = vadd.f32 1e-05, %v980_v11 }
 0x162   :  { %1354 = vrsqrt.f32 %v989_v12 }
 0x163   :  { %1356 = vrcp.f32 %v818_v25 }
 0x16c   :  { %v1355_v46 = vpop.eup %1354 }
 0x16d   :  { %v995_v17 = vmul.f32 %v1355_v46, %v985_v61  ;;  %v996_v23 = vmul.f32 %v1355_v46, %v986_v0  ;;  %v997_v52 = vmul.f32 %v1355_v46, %v987_v2  ;;  %v991_v44 = vmul.f32 %v1355_v46, %v981_v3 }
 0x16e   :  { %v992_v53 = vmul.f32 %v1355_v46, %v982_v4  ;;  %v993_v62 = vmul.f32 %v1355_v46, %v983_v5  ;;  %v994_v27 = vmul.f32 %v1355_v46, %v984_v7  ;;  %v998_v26 = vmul.f32 %v1355_v46, %v988_v10  ;;  %v1357_v5 = vpop.eup %1356  ;;  %v1142_v46 = vld [vmem:[%s1744_s2 + $0x1] ss:$0 sm:$0xff] }
 0x16f   :  { %v1011_v30 = vmul.f32 %v1003_v14, %v995_v17  ;;  %v1012_v31 = vmul.f32 %v1004_v8, %v996_v23  ;;  %v1013_v32 = vmul.f32 %v1005_v63, %v997_v52  ;;  %v1007_v33 = vmul.f32 %v999_v15, %v991_v44 }
 0x170   :  { %v1008_v34 = vmul.f32 %v1000_v16, %v992_v53  ;;  %v1009_v37 = vmul.f32 %v1001_v19, %v993_v62  ;;  %v1010_v38 = vmul.f32 %v1002_v29, %v994_v27  ;;  %v1014_v39 = vmul.f32 %v1006_v24, %v998_v26 }
 0x171   :  { %v1019_v40 = vmax.f32 %v1011_v30, 0.0  ;;  %v1020_v20 = vmax.f32 %v1012_v31, 0.0  ;;  %v1021_v21 = vmax.f32 %v1013_v32, 0.0  ;;  %v1015_v41 = vmax.f32 %v1007_v33, 0.0 }
 0x172   :  { %v1016_v42 = vmax.f32 %v1008_v34, 0.0  ;;  %v1017_v9 = vmax.f32 %v1009_v37, 0.0  ;;  %v1018_v43 = vmax.f32 %v1010_v38, 0.0  ;;  %v1022_v45 = vmax.f32 %v1014_v39, 0.0 }
 0x173   :  { %v1028_v47 = vsel %vm1691_vm8, %v1020_v20, 0.0  ;;  %v1091_v31 = vstv %s1746_s4 }
 0x174   :  { %v1045_v48 = vadd.f32 %v1028_v47, %v1019_v40  ;;  %v1024_v49 = vsel %vm1628_vm6, %v1016_v42, 0.0  ;;  %v1026_v50 = vsel %vm1640_vm7, %v1018_v43, 0.0  ;;  %v1030_v51 = vsel %vm1704_vm9, %v1022_v45, 0.0 }
 0x175   :  { %v1031_v54 = vadd.f32 %v1024_v49, %v1015_v41  ;;  %v1038_v55 = vadd.f32 %v1026_v50, %v1017_v9  ;;  %v1052_v56 = vadd.f32 %v1030_v51, %v1021_v21 }
 0x176   :  { %v1046_v57 = vrot.slane %v1045_v48, 4 }
 0x177   :  { %v1032_v58 = vrot.slane %v1031_v54, 4  ;;  %v1039_v18 = vrot.slane %v1038_v55, 4  ;;  %v1053_v59 = vrot.slane %v1052_v56, 4 }
 0x178   :  { %v1047_v60 = vadd.f32 %v1046_v57, %v1045_v48 }
 0x179   :  { %v1033_v35 = vadd.f32 %v1032_v58, %v1031_v54  ;;  %v1040_v13 = vadd.f32 %v1039_v18, %v1038_v55  ;;  %v1054_v36 = vadd.f32 %v1053_v59, %v1052_v56 }
 0x17a   :  { %v1048_v61 = vrot.slane %v1047_v60, 2 }
 0x17b   :  { %v1034_v22 = vrot.slane %v1033_v35, 2  ;;  %v1041_v0 = vrot.slane %v1040_v13, 2  ;;  %v1055_v2 = vrot.slane %v1054_v36, 2 }
 0x17c   :  { %v1049_v28 = vadd.f32 %v1048_v61, %v1047_v60 }
 0x17d   :  { %v1035_v3 = vadd.f32 %v1034_v22, %v1033_v35  ;;  %v1042_v4 = vadd.f32 %v1041_v0, %v1040_v13  ;;  %v1056_v1 = vadd.f32 %v1055_v2, %v1054_v36 }
 0x17e   :  { %v1050_v25 = vrot.slane %v1049_v28, 1 }
 0x17f   :  { %v1036_v6 = vrot.slane %v1035_v3, 1  ;;  %v1043_v7 = vrot.slane %v1042_v4, 1  ;;  %v1057_v10 = vrot.slane %v1056_v1, 1 }
 0x180   :  { %v1051_v11 = vadd.f32 %v1050_v25, %v1049_v28 }
 0x181   :  { %v1037_v12 = vadd.f32 %v1036_v6, %v1035_v3  ;;  %v1044_v14 = vadd.f32 %v1043_v7, %v1042_v4  ;;  %v1058_v8 = vadd.f32 %v1057_v10, %v1056_v1 }
 0x182   :  { %v1062_v63 = vmul.f32 %v1357_v5, %v1051_v11 }
 0x183   :  { %v1060_v15 = vmul.f32 %v1357_v5, %v1037_v12  ;;  %v1061_v16 = vmul.f32 %v1357_v5, %v1044_v14  ;;  %v1063_v17 = vmul.f32 %v1357_v5, %v1058_v8 }
 0x184   :  { %v1071_v23 = vmul.f32 %v1142_v46, %v1062_v63 }
 0x185   :  { %v1070_v52 = vmul.f32 %v1142_v46, %v1061_v16  ;;  %v1072_v44 = vmul.f32 %v1142_v46, %v1063_v17  ;;  %v1069_v29 = vmul.f32 %v1142_v46, %v1060_v15 }
 0x186   :  { %v1080_v19 = vrot.slane %v1071_v23, 6 }
 0x187   :  { %v1077_v24 = vrot.slane %v1070_v52, 7  ;;  %v1083_v62 = vrot.slane %v1072_v44, 5 }
 0x189   :  { %v1079_v53 = vsel %vm1078_vm10, %v1077_v24, %v1069_v29 }
 0x18a   :  { %v1082_v27 = vsel %vm1081_vm11, %v1080_v19, %v1079_v53 }
 0x18b   :  { %v1085_v26 = vsel %vm1084_vm12, %v1083_v62, %v1082_v27 }
 0x18c   :  { %v1087_v30 = vsel %vm767_vm4, %v1085_v26, 0.0 }
 0x18d   :  { %1088 = vadd.xlane.f32.xlu0 %v1087_v30 }
 0x21a   :  { %v1089_v32 = vpop.xlane.xlu0 %1088 }
 0x21b   :  { %v1092_v33 = vadd.f32 %v1091_v31, %v1089_v32 }
 0x21d   :  { %1094 = vst.msk [vmem:[%s1747_s5] sm:$0xf] %vm1093_vm13, %v1092_v33 }
 0x21e   :  { %1099 = vsyncpa [#allocation4], 1 }
 0x21f   :  { %1100 = vsyncpa [#allocation6], 1 }

</bundles_post_ra>
